<compile_context>
chip_gen: v7x
topology: tpu7x:2x2x1
jax: 0.10.0
libtpu: 0.0.40
codegen_flags: <defaults>
</compile_context>

<pallas_src>
import jax
import jax.numpy as jnp
from jax.experimental import pallas as pl
from jax.experimental.pallas import tpu as pltpu


def _round_up(x, m):
    return ((x + m - 1) // m) * m


# ----------------------------------------------------------------------------
# Kernel: batched dot-product scores + softmax over time, fused.
#   hidden_ref : (Bb, H)       decoder hidden for this batch tile (native dtype)
#   enc_ref    : (T, Bb, H)    encoder outputs for this batch tile (native dtype)
#   out_ref    : (Bb, T_pad)   softmax attention weights (model dtype, lane-dense)
#   s_ref      : (Bb, T_pad)   f32 VMEM scratch for the lane-dense score slab
# ----------------------------------------------------------------------------
def _attn_kernel(hidden_ref, enc_ref, out_ref, s_ref):
    t = enc_ref.shape[0]
    t_pad = out_ref.shape[-1]

    # Cast AFTER the (native-dtype) DMA; accumulate in f32.
    # TODO(synk): on v6e/v7x the multiply could stay in bf16 (f32 accumulate only)
    # to halve vreg pressure; kept in f32 so the same kernel is also safe on v5e.
    h = hidden_ref[...].astype(jnp.float32)                # (Bb, H)
    enc = enc_ref[...].astype(jnp.float32)                 # (T, Bb, H)

    # scores[t, b] = sum_h enc[t, b, h] * hidden[b, h]  (VPU multiply, lane reduce)
    scores_tb = jnp.sum(enc * h[None, :, :], axis=-1)      # (T, Bb) f32
    scores = scores_tb.T                                   # (Bb, T) — tiny XLU transpose

    if t_pad > t:
        # Lane-dense (Bb, T_pad) slab; padded columns get a huge negative score so
        # they come out of the softmax as exact zeros.
        s_ref[...] = jnp.full(s_ref.shape, -1e30, dtype=s_ref.dtype)
        s_ref[:, :t] = scores
        scores = s_ref[...]

    # Numerically-stable softmax over time (lane axis).  == F.softmax(dim=1).
    m = jnp.max(scores, axis=-1, keepdims=True)
    e = jnp.exp(scores - m)
    denom = jnp.sum(e, axis=-1, keepdims=True)
    out_ref[...] = (e * pl.reciprocal(denom, approx=True)).astype(out_ref.dtype)


def _pick_block_b(B, T, H, enc_itemsize, out_itemsize, vmem_budget_bytes):
    """Largest batch tile (multiple of 8) whose working set fits the VMEM budget,
    capped so the grid has >= 2 steps when B allows (v7x megacore)."""
    h_pad = _round_up(H, 128)                 # lane padding of the contracted dim
    t_pad = _round_up(T, 128)
    per_b = (2 * T * h_pad * enc_itemsize     # double-buffered encoder input tile
             + 2 * T * h_pad * 4              # f32 intermediates of the mul/reduce
             + 2 * h_pad * enc_itemsize       # double-buffered hidden tile
             + 2 * t_pad * out_itemsize       # double-buffered output tile
             + t_pad * 4)                     # score scratch
    max_b = max(8, (vmem_budget_bytes // per_b) // 8 * 8)
    if B <= 8:
        return B                              # single tile; block dims == full dims
    two_step_cap = _round_up((B + 1) // 2, 8)  # >= 2 grid steps for megacore
    return max(8, min(max_b, two_step_cap))


def attn_forward(hidden, encoder_outputs, *, block_b=None,
                 vmem_budget_bytes=32 * 1024 * 1024):
    """Matches Attn.forward.

    hidden:          (1, B, H)
    encoder_outputs: (T, B, H)
    returns:         (B, 1, T) attention weights (softmax over T), in the
                     encoder_outputs dtype.
    """
    _, B, H = hidden.shape
    T = encoder_outputs.shape[0]
    out_dtype = encoder_outputs.dtype
    t_pad = _round_up(T, 128)

    h2 = hidden.reshape(B, H)        # metadata reshape; keep native dtype
    enc = encoder_outputs            # keep native dtype (no f32 upcast in HBM)

    if block_b is None:
        block_b = _pick_block_b(B, T, H,
                                jnp.dtype(enc.dtype).itemsize,
                                jnp.dtype(out_dtype).itemsize,
                                vmem_budget_bytes)
    block_b = min(block_b, B)
    grid = (pl.cdiv(B, block_b),)    # cdiv: batch tail is computed, not dropped

    attn_padded = pl.pallas_call(
        _attn_kernel,
        out_shape=jax.ShapeDtypeStruct((B, t_pad), out_dtype),
        grid_spec=pltpu.PrefetchScalarGridSpec(
            num_scalar_prefetch=0,
            grid=grid,
            in_specs=[
                pl.BlockSpec((block_b, H), lambda i: (i, 0)),        # hidden tile
                # With the module's (T, B, H) layout each step DMAs T strided
                # chunks of block_b*H bytes; the large block_b keeps chunks big.
                pl.BlockSpec((T, block_b, H), lambda i: (0, i, 0)),  # encoder tile
            ],
            out_specs=pl.BlockSpec((block_b, t_pad), lambda i: (i, 0)),
            scratch_shapes=[pltpu.VMEM((block_b, t_pad), jnp.float32)],
        ),
        compiler_params=pltpu.CompilerParams(
            dimension_semantics=("parallel",),   # batch tiles are independent
            vmem_limit_bytes=48 * 1024 * 1024,   # headroom over budget; < v7x 64 MiB
        ),
    )(h2, enc)

    attn_bt = attn_padded[:, :T] if t_pad > T else attn_padded
    # unsqueeze(1): (B, T) -> (B, 1, T).  Pure metadata reshape.
    return attn_bt[:, None, :]


if __name__ == "__main__":
    # Small shapes consistent with the surrounding model: seq=8, batch=4, hidden=32.
    T, B, H = 8, 4, 32

    key = jax.random.PRNGKey(0)
    k_h, k_e = jax.random.split(key)
    hidden = jax.random.normal(k_h, (1, B, H), dtype=jnp.float32)
    encoder_outputs = jax.random.normal(k_e, (T, B, H), dtype=jnp.float32)

    attn = jax.block_until_ready(attn_forward(hidden, encoder_outputs))
    assert attn.shape == (B, 1, T)

    # Plain-JAX reference of the torch ops (bmm + softmax) for a sanity check.
    scores_ref = jnp.einsum("bh,tbh->bt", hidden[0], encoder_outputs)
    ref = jax.nn.softmax(scores_ref, axis=-1)[:, None, :]
    # Tolerance allows the EUP approximate-reciprocal softmax denominator.
    assert jnp.allclose(attn.astype(jnp.float32), ref, atol=2e-3, rtol=2e-3), (
        float(jnp.max(jnp.abs(attn.astype(jnp.float32) - ref))))

    print("KERNEL_OK")
</pallas_src>

<mosaic_0001>
module attributes {stable_mosaic.version = 11 : i64} {
  func.func @_attn_kernel(%arg0: i32, %arg1: memref<4x32xf32, #tpu.memory_space<vmem>>, %arg2: memref<8x4x32xf32, #tpu.memory_space<vmem>>, %arg3: memref<4x128xf32, #tpu.memory_space<vmem>>, %arg4: memref<4x128xf32, #tpu.memory_space<vmem>>) attributes {dimension_semantics = [#tpu.dimension_semantics<parallel>], iteration_bounds = array<i64: 1>, scalar_prefetch = 0 : i64, scratch_operands = 1 : i64, tpu.core_type = #tpu.core_type<tc>, window_params = [{transform_indices = @transform_0, window_bounds = array<i64: 4, 32>}, {transform_indices = @transform_1, window_bounds = array<i64: 8, 4, 32>}, {transform_indices = @transform_2, window_bounds = array<i64: 4, 128>}]} {
    %c0 = arith.constant 0 : index
    %c0_0 = arith.constant 0 : index
    %0 = vector.load %arg1[%c0, %c0_0] : memref<4x32xf32, #tpu.memory_space<vmem>>, vector<4x32xf32>
    %c0_1 = arith.constant 0 : index
    %c0_2 = arith.constant 0 : index
    %c0_3 = arith.constant 0 : index
    %1 = vector.load %arg2[%c0_1, %c0_2, %c0_3] : memref<8x4x32xf32, #tpu.memory_space<vmem>>, vector<8x4x32xf32>
    %2 = vector.shape_cast %0 : vector<4x32xf32> to vector<1x4x32xf32>
    %3 = vector.broadcast %2 : vector<1x4x32xf32> to vector<8x4x32xf32>
    %4 = arith.mulf %1, %3 : vector<8x4x32xf32>
    %cst = arith.constant dense<0.000000e+00> : vector<8x4xf32>
    %5 = vector.multi_reduction <add>, %4, %cst [2] : vector<8x4x32xf32> to vector<8x4xf32>
    %6 = tpu.transpose %5, [1, 0] : vector<8x4xf32> -> vector<4x8xf32>
    %cst_4 = arith.constant -1.000000e+30 : f32
    %7 = vector.broadcast %cst_4 : f32 to vector<4x128xf32>
    %c0_5 = arith.constant 0 : index
    %c0_6 = arith.constant 0 : index
    %8 = vector.load %arg4[%c0_5, %c0_6] : memref<4x128xf32, #tpu.memory_space<vmem>>, vector<4x128xf32>
    tpu.vector_store %arg4[%c0_5, %c0_6], %7 {strides = array<i32>} : memref<4x128xf32, #tpu.memory_space<vmem>>, vector<4x128xf32>,
    %c0_7 = arith.constant 0 : index
    %c0_8 = arith.constant 0 : index
    %9 = vector.load %arg4[%c0_7, %c0_8] : memref<4x128xf32, #tpu.memory_space<vmem>>, vector<4x8xf32>
    tpu.vector_store %arg4[%c0_7, %c0_8], %6 {strides = array<i32>} : memref<4x128xf32, #tpu.memory_space<vmem>>, vector<4x8xf32>,
    %c0_9 = arith.constant 0 : index
    %c0_10 = arith.constant 0 : index
    %10 = vector.load %arg4[%c0_9, %c0_10] : memref<4x128xf32, #tpu.memory_space<vmem>>, vector<4x128xf32>
    %cst_11 = arith.constant dense<0xFF800000> : vector<4xf32>
    %11 = vector.multi_reduction <maximumf>, %10, %cst_11 [1] : vector<4x128xf32> to vector<4xf32>
    %12 = vector.shape_cast %11 : vector<4xf32> to vector<4x1xf32>
    %13 = vector.broadcast %12 : vector<4x1xf32> to vector<4x128xf32>
    %14 = arith.subf %10, %13 : vector<4x128xf32>
    %15 = math.exp %14 : vector<4x128xf32>
    %cst_12 = arith.constant dense<0.000000e+00> : vector<4xf32>
    %16 = vector.multi_reduction <add>, %15, %cst_12 [1] : vector<4x128xf32> to vector<4xf32>
    %17 = vector.shape_cast %16 : vector<4xf32> to vector<4x1xf32>
    %18 = tpu.reciprocal %17 {approx = true} : vector<4x1xf32> -> vector<4x1xf32>
    %19 = vector.broadcast %18 : vector<4x1xf32> to vector<4x128xf32>
    %20 = arith.mulf %15, %19 : vector<4x128xf32>
    %c0_13 = arith.constant 0 : index
    %c0_14 = arith.constant 0 : index
    %21 = vector.load %arg3[%c0_13, %c0_14] : memref<4x128xf32, #tpu.memory_space<vmem>>, vector<4x128xf32>
    tpu.vector_store %arg3[%c0_13, %c0_14], %20 {strides = array<i32>} : memref<4x128xf32, #tpu.memory_space<vmem>>, vector<4x128xf32>,
    return
  }
  func.func @transform_0(%arg0: i32) -> (i32, i32) {
    %c0_i32 = arith.constant 0 : i32
    %c0_i32_0 = arith.constant 0 : i32
    return %arg0, %c0_i32 : i32, i32
  }
  func.func @transform_1(%arg0: i32) -> (i32, i32, i32) {
    %c0_i32 = arith.constant 0 : i32
    %c0_i32_0 = arith.constant 0 : i32
    %c0_i32_1 = arith.constant 0 : i32
    return %c0_i32, %arg0, %c0_i32_0 : i32, i32, i32
  }
  func.func @transform_2(%arg0: i32) -> (i32, i32) {
    %c0_i32 = arith.constant 0 : i32
    %c0_i32_0 = arith.constant 0 : i32
    return %arg0, %c0_i32 : i32, i32
  }
}

</mosaic_0001>

<bundles_post_ra>
// kernel: tpu_custom_call.1
= control target key start
LH: loop header
LB: loop body
LE: loop exit
PB: predicated region body
PF: predicated region fallthrough
CT: control target
= control target key end

     0   :  { %7 = vsyncpa [#allocation4], 0  ;;  %s357_s0 = inlined_call_operand.hbm [shape: f32[4,32], index: 0, kind: input, shape index: {}]   ;;  %s358_s1 = inlined_call_operand.hbm [shape: f32[8,4,32], index: 1, kind: input, shape index: {}]   ;;  %s359_s2 = inlined_call_operand.hbm [shape: f32[4,128], index: 2, kind: output, shape index: {}]  }
   0x1   :  { %8 = vsyncpa [#allocation7], 0 }
   0x2   :  { %9 = vsyncpa [#allocation5], 0  ;;  %s285_s9 = smov [#allocation3]   ;;  %s286_s11 = smov [#allocation6]  }
   0x3   :  { %s16_s10 = sshll.u32 %s285_s9, 4  ;;  %s25_s12 = sshll.u32 %s286_s11, 4  ;;  %s17_s10 = int_to_ptr.vmem [resolvable:$true] %s16_s10  ;;  %s306_s12 = int_to_ptr.vmem [resolvable:$true] %s25_s12 }
   0x4   :  { %s213_s15 = scalar_lea.hbm %s357_s0, 64 }
   0x5   :  { %p214_p0 = scmp.ne.s32.totalorder %s357_s0, %s213_s15  ;;  %p217_p1 = scmp.lt.u32.totalorder %s213_s15, %s357_s0 }
   0x7   :  { %p219_p2 = pnand %p217_p1, %p214_p0 }
   0x9   :  { %222 = shalt.err (!%p219_p2)
}
   0xa   :  { %s223_s20 = scalar_lea.vmem %s17_s10, 64  ;;  %p228_p4 = scmp.lt.s32.totalorder %s17_s10, %s17_s10 }
   0xb   :  { %p224_p3 = scmp.ne.s32.totalorder %s17_s10, %s223_s20  ;;  %p229_p5 = scmp.lt.s32.totalorder %s223_s20, %s223_s20 }
   0xd   :  { %p230_p6 = por %p229_p5, %p228_p4 }
   0xf   :  { %p231_p7 = pnand %p230_p6, %p224_p3 }
  0x11   :  { %234 = shalt.err (!%p231_p7)
}
  0x12   :  { %19 = dma.hbm_to_vmem [thread:$0]  %s357_s0, 64, %s17_s10, [#allocation4]  }
  0x13   :  { %s235_s25 = scalar_lea.hbm %s358_s1, 512 }
  0x14   :  { %p236_p8 = scmp.ne.s32.totalorder %s358_s1, %s235_s25  ;;  %p239_p9 = scmp.lt.u32.totalorder %s235_s25, %s358_s1 }
  0x16   :  { %p241_p10 = pnand %p239_p9, %p236_p8 }
  0x18   :  { %244 = shalt.err (!%p241_p10)
}
  0x19   :  { %s245_s30 = scalar_lea.vmem %s306_s12, 512  ;;  %p250_p12 = scmp.lt.s32.totalorder %s306_s12, %s306_s12 }
  0x1a   :  { %p246_p11 = scmp.ne.s32.totalorder %s306_s12, %s245_s30  ;;  %p251_p13 = scmp.lt.s32.totalorder %s245_s30, %s245_s30 }
  0x1c   :  { %p252_p0 = por %p251_p13, %p250_p12 }
  0x1e   :  { %p253_p1 = pnand %p252_p0, %p246_p11 }
  0x20   :  { %256 = shalt.err (!%p253_p1)
}
  0x21   :  { %s287_s0 = smov 64   ;;  %s288_s3 = smov 4  }
  0x22   :  { %31 = dma.hbm_to_vmem [thread:$0]  %s358_s1, 512, %s306_s12, [#allocation7], %s287_s0, %s287_s0, %s288_s3  }
  0x23   :  { %279 = dma.done.wait [#allocation4], 64  }
  0x24   :  { %280 = vsyncadd [#allocation4], 4294967232 }
  0x25   :  { %281 = dma.done.wait [#allocation7], 512  }
  0x26   :  { %282 = vsyncadd [#allocation7], 4294966784  ;;  %vm55_vm0 = vcmask 257024   ;;  %v38_v0 = vld [vmem:[#allocation3] sm:$0xf]  ;;  %v88_v26 = vlaneseq  ;;  %vm122_vm1 = vcmask 1041409  }
  0x27   :  { %v39_v1 = vld [vmem:[#allocation6] sm:$0xf]  ;;  %v41_v2 = vld [vmem:[#allocation6 + $0x8] sm:$0xf]  ;;  %v40_v5 = vld [vmem:[#allocation6 + $0x4] sm:$0xf] }
  0x28   :  { %v47_v3 = vmul.f32 %v39_v1, %v38_v0  ;;  %v49_v4 = vmul.f32 %v41_v2, %v38_v0  ;;  %v42_v6 = vld [vmem:[#allocation6 + $0xc] sm:$0xf]  ;;  %v48_v7 = vmul.f32 %v40_v5, %v38_v0  ;;  %v43_v9 = vld [vmem:[#allocation6 + $0x10] sm:$0xf]  ;;  %v44_v10 = vld [vmem:[#allocation6 + $0x14] sm:$0xf] }
  0x29   :  { %v50_v8 = vmul.f32 %v42_v6, %v38_v0  ;;  %v51_v15 = vmul.f32 %v43_v9, %v38_v0  ;;  %v52_v16 = vmul.f32 %v44_v10, %v38_v0  ;;  %v45_v17 = vld [vmem:[#allocation6 + $0x18] sm:$0xf]  ;;  %v46_v18 = vld [vmem:[#allocation6 + $0x1c] sm:$0xf]  ;;  %v289_v25 = vmov -1e+30  }
  0x2a   :  { %v56_v11 = vsel %vm55_vm0, %v47_v3, 0.0  ;;  %v62_v12 = vsel %vm55_vm0, %v49_v4, 0.0  ;;  %v59_v13 = vsel %vm55_vm0, %v48_v7, 0.0  ;;  %v53_v21 = vmul.f32 %v45_v17, %v38_v0  ;;  %169 = vst [vmem:[#allocation2] sm:$0xf] %v289_v25  ;;  %s290_s1 = smov [#allocation8]  }
  0x2b   :  { %57 = vadd.xlane.f32.xlu0 %v56_v11  ;;  %63 = vadd.xlane.f32.xlu1 %v62_v12  ;;  %v65_v14 = vsel %vm55_vm0, %v50_v8, 0.0  ;;  %v68_v19 = vsel %vm55_vm0, %v51_v15, 0.0  ;;  %v71_v20 = vsel %vm55_vm0, %v52_v16, 0.0  ;;  %v54_v22 = vmul.f32 %v46_v18, %v38_v0  ;;  %s192_s6 = sshll.u32 %s290_s1, 4  ;;  %s193_s6 = int_to_ptr.vmem [resolvable:$true] %s192_s6 }
  0x2c   :  { %v74_v23 = vsel %vm55_vm0, %v53_v21, 0.0  ;;  %v89_v27 = vand.u32 127, %v88_v26  ;;  %v91_v28 = vshrl.u32 %v88_v26, 7  ;;  %vm124_vm2 = vcmask 1042434   ;;  %s257_s7 = scalar_lea.vmem %s193_s6, 64  ;;  %p262_p3 = scmp.lt.s32.totalorder %s193_s6, %s193_s6 }
  0x2d   :  { %v77_v24 = vsel %vm55_vm0, %v54_v22, 0.0  ;;  %vm126_vm3 = vcmask 1043459   ;;  %vm128_vm4 = vcmask 1044484   ;;  %vm130_vm5 = vcmask 1045509   ;;  %p258_p2 = scmp.ne.s32.totalorder %s193_s6, %s257_s7  ;;  %p263_p4 = scmp.lt.s32.totalorder %s257_s7, %s257_s7 }
  0x2e   :  { %v92_v31 = vsub.s32 %v89_v27, %v91_v28  ;;  %vm132_vm6 = vcmask 1046534   ;;  %vm134_vm7 = vcmask 1047559   ;;  %vm170_vm8 = vcmask 60416  }
  0x2f   :  { %60 = vadd.xlane.f32.xlu0 %v59_v13  ;;  %66 = vadd.xlane.f32.xlu1 %v65_v14  ;;  %vm173_vm9 = vcmask 1043456   ;;  %p264_p5 = por %p263_p4, %p262_p3 }
  0x31   :  { %p265_p6 = pnand %p264_p5, %p258_p2 }
  0x33   :  { %69 = vadd.xlane.f32.xlu0 %v68_v19  ;;  %72 = vadd.xlane.f32.xlu1 %v71_v20 }
  0x37   :  { %75 = vadd.xlane.f32.xlu0 %v74_v23  ;;  %78 = vadd.xlane.f32.xlu1 %v77_v24 }
  0xb8   :  { %v58_v29 = vpop.xlane.xlu0 %57  ;;  %v64_v30 = vpop.xlane.xlu1 %63 }
  0xb9   :  { %v93_v34 = vrot.slane %v58_v29, %v92_v31  ;;  %v101_v37 = vrot.slane %v64_v30, %v92_v31 }
  0xbc   :  { %v61_v32 = vpop.xlane.xlu0 %60  ;;  %v67_v33 = vpop.xlane.xlu1 %66 }
  0xbd   :  { %v97_v35 = vrot.slane %v61_v32, %v92_v31  ;;  %v105_v36 = vrot.slane %v67_v33, %v92_v31 }
  0xbf   :  { %v123_v38 = vsel %vm122_vm1, %v97_v35, %v93_v34 }
  0xc0   :  { %v125_v39 = vsel %vm124_vm2, %v101_v37, %v123_v38  ;;  %v70_v40 = vpop.xlane.xlu0 %69  ;;  %v73_v41 = vpop.xlane.xlu1 %72 }
  0xc1   :  { %v127_v42 = vsel %vm126_vm3, %v105_v36, %v125_v39  ;;  %v109_v43 = vrot.slane %v70_v40, %v92_v31  ;;  %v113_v44 = vrot.slane %v73_v41, %v92_v31 }
  0xc3   :  { %v129_v45 = vsel %vm128_vm4, %v109_v43, %v127_v42 }
  0xc4   :  { %v76_v46 = vpop.xlane.xlu0 %75  ;;  %v79_v47 = vpop.xlane.xlu1 %78  ;;  %v131_v50 = vsel %vm130_vm5, %v113_v44, %v129_v45 }
  0xc5   :  { %v117_v48 = vrot.slane %v76_v46, %v92_v31  ;;  %v121_v49 = vrot.slane %v79_v47, %v92_v31 }
  0xc7   :  { %v133_v51 = vsel %vm132_vm6, %v117_v48, %v131_v50 }
  0xc8   :  { %v135_v52 = vsel %vm134_vm7, %v121_v49, %v133_v51 }
  0xc9   :  { %137 = vxpose.xlu0.b32.start.end [1/1] (short) (narrow) %v135_v52, 8 }
 0x149   :  { %v153_v53 = vpop.trf.xlu0 }
 0x14a   :  { %171 = vst.msk [vmem:[#allocation2] sm:$0xf] %vm170_vm8, %v153_v53 }
 0x151   :  { %v172_v54 = vld [vmem:[#allocation2] sm:$0xf] }
 0x152   :  { %v174_v55 = vsel %vm173_vm9, %v172_v54, -inf }
 0x153   :  { %175 = vmax.xlane.f32.xlu1 %v174_v55 }
 0x1e0   :  { %v176_v56 = vpop.xlane.xlu1 %175 }
 0x1e1   :  { %v177_v57 = vsub.f32 %v172_v54, %v176_v56 }
 0x1e3   :  { %v178_v58 = vmul.f32 1.442695, %v177_v57 }
 0x1e5   :  { %209 = vpow2.f32 %v178_v58 }
 0x1ef   :  { %v210_v59 = vpop.eup %209 }
 0x1f0   :  { %v180_v60 = vsel %vm173_vm9, %v210_v59, 0.0 }
 0x1f1   :  { %181 = vadd.xlane.f32.xlu1 %v180_v60 }
 0x27e   :  { %v182_v61 = vpop.xlane.xlu1 %181 }
 0x27f   :  { %211 = vrcp.f32 %v182_v61 }
 0x289   :  { %v212_v62 = vpop.eup %211 }
 0x28a   :  { %v184_v63 = vmul.f32 %v212_v62, %v210_v59 }
 0x28c   :  { %185 = vst [vmem:[#allocation8] sm:$0xf] %v184_v63 }
 0x28d   :  { %268 = shalt.err (!%p265_p6)
}
 0x28e   :  { %s269_s10 = scalar_lea.hbm %s359_s2, 64 }
 0x28f   :  { %p270_p7 = scmp.ne.s32.totalorder %s359_s2, %s269_s10  ;;  %p273_p8 = scmp.lt.u32.totalorder %s269_s10, %s359_s2 }
 0x291   :  { %p275_p9 = pnand %p273_p8, %p270_p7 }
 0x293   :  { %278 = shalt.err (!%p275_p9)
}
 0x294   :  { %195 = dma.vmem_to_hbm [thread:$0]  %s193_s6, 64, %s359_s2, [#allocation5]  }
 0x295   :  { %283 = dma.done.wait [#allocation5], 64  }
 0x296   :  { %284 = vsyncadd [#allocation5], 4294967232 }
 0x297   :  { %199 = vsyncpa [#allocation4], 1 }
 0x298   :  { %200 = vsyncpa [#allocation7], 1 }
 0x299   :  { %201 = vsyncpa [#allocation5], 1 }

</bundles_post_ra>
